<compile_context>
chip_gen: v6e
topology: v6e:2x2x1
jax: 0.10.0
libtpu: 0.0.40
codegen_flags: <defaults>
</compile_context>

<pallas_src>
import jax
import jax.numpy as jnp
from jax.experimental import pallas as pl
from jax.experimental.pallas import tpu as pltpu

LN_EPS = 1e-5      # torch.nn.LayerNorm default eps
LANE = 128
SUBLANE = 8


def _round_up(x, m):
    return ((x + m - 1) // m) * m


def skill_actor_kernel(x_ref, w1_ref, b1_ref, g_ref, beta_ref,
                       w2_ref, b2_ref, w3_ref, b3_ref, out_ref):
    mm_dtype = w1_ref.dtype  # bf16 (default) or f32 — set by the wrapper

    # ---- trunk: Linear(obs_dim -> feature_dim), f32 accumulate ----
    h = jnp.dot(x_ref[...], w1_ref[...], preferred_element_type=jnp.float32)
    h = h + b1_ref[...]

    # ---- trunk: LayerNorm(feature_dim)  (all stats in f32) ----
    mean = jnp.mean(h, axis=-1, keepdims=True)
    centered = h - mean
    var = jnp.mean(centered * centered, axis=-1, keepdims=True)
    h = centered * jax.lax.rsqrt(var + LN_EPS)
    h = h * g_ref[...] + beta_ref[...]

    # ---- trunk: Tanh (f32) ----
    h = jnp.tanh(h)

    # ---- policy: Linear(feature_dim -> hidden_dim) + ReLU ----
    h = jnp.dot(h.astype(mm_dtype), w2_ref[...],
                preferred_element_type=jnp.float32) + b2_ref[...]
    h = jnp.maximum(h, 0.0)

    # ---- policy: Linear(hidden_dim -> skill_dim_padded) ----
    logits = jnp.dot(h.astype(mm_dtype), w3_ref[...],
                     preferred_element_type=jnp.float32) + b3_ref[...]
    out_ref[...] = logits.astype(out_ref.dtype)


def skill_actor_forward(obs, params, *, batch_tile=None,
                        matmul_dtype=jnp.bfloat16, out_dtype=None,
                        max_batch_tile=1024):
    """obs: (B, obs_dim). params: dict of weights/biases (see init_params).

    matmul_dtype: dtype fed to the MXU (bf16 by default; f32 for exactness).
    out_dtype:    logits dtype (defaults to obs.dtype; pass bf16 to halve
                  writeback bytes if the consumer tolerates it).
    """
    B, obs_dim = obs.shape
    w1, b1, g, beta, w2, b2, w3, b3 = (
        params["w1"], params["b1"], params["ln_g"], params["ln_b"],
        params["w2"], params["b2"], params["w3"], params["b3"],
    )
    feature_dim = w1.shape[1]
    hidden_dim = w2.shape[1]
    skill_dim = w3.shape[1]
    out_dtype = obs.dtype if out_dtype is None else out_dtype

    # ---- batch tiling: one big tile for small B, 1024-row tiles otherwise ----
    if batch_tile is None:
        batch_tile = min(_round_up(B, SUBLANE), max_batch_tile)
    else:
        batch_tile = _round_up(batch_tile, SUBLANE)
    B_pad = _round_up(B, batch_tile)
    grid = (B_pad // batch_tile,)

    # obs is the only batch-scaling array: cast to matmul dtype (halves HBM
    # stream for bf16), pad rows with zeros if needed. Do NOT pad obs_dim.
    obs_mm = obs.astype(matmul_dtype)
    if B_pad != B:
        obs_mm = jnp.pad(obs_mm, ((0, B_pad - B), (0, 0)))

    # ---- lane-dense output: pad skill_dim (w3 cols / b3) to 128 lanes ----
    skill_pad = _round_up(skill_dim, LANE)
    w3p = jnp.pad(w3, ((0, 0), (0, skill_pad - skill_dim))).astype(matmul_dtype)
    b3p = jnp.pad(b3, ((0, 0), (0, skill_pad - skill_dim))).astype(jnp.float32)

    w1m = w1.astype(matmul_dtype)
    w2m = w2.astype(matmul_dtype)
    b1f = b1.astype(jnp.float32)
    b2f = b2.astype(jnp.float32)
    gf = g.astype(jnp.float32)
    betaf = beta.astype(jnp.float32)

    # Weights/biases get full-array blocks, constant across the batch grid.
    full = lambda shape: pl.BlockSpec(shape, lambda i: (0,) * len(shape))

    out = pl.pallas_call(
        skill_actor_kernel,
        out_shape=jax.ShapeDtypeStruct((B_pad, skill_pad), out_dtype),
        grid_spec=pltpu.PrefetchScalarGridSpec(
            num_scalar_prefetch=0,
            grid=grid,
            in_specs=[
                pl.BlockSpec((batch_tile, obs_dim), lambda i: (i, 0)),  # obs
                full((obs_dim, feature_dim)),     # w1
                full((1, feature_dim)),           # b1
                full((1, feature_dim)),           # ln gamma
                full((1, feature_dim)),           # ln beta
                full((feature_dim, hidden_dim)),  # w2
                full((1, hidden_dim)),            # b2
                full((hidden_dim, skill_pad)),    # w3 (lane-padded)
                full((1, skill_pad)),             # b3 (lane-padded)
            ],
            out_specs=pl.BlockSpec((batch_tile, skill_pad), lambda i: (i, 0)),
        ),
        compiler_params=pltpu.CompilerParams(
            dimension_semantics=("parallel",)),
    )(obs_mm, w1m, b1f, gf, betaf, w2m, b2f, w3p, b3p)

    return out[:B, :skill_dim]


def init_params(key, obs_dim, skill_dim, feature_dim, hidden_dim):
    """Deterministic synthetic init (stand-in for utils.weight_init)."""
    k1, k2, k3 = jax.random.split(key, 3)
    scale = lambda fan_in: 1.0 / jnp.sqrt(jnp.float32(fan_in))
    return {
        "w1": jax.random.normal(k1, (obs_dim, feature_dim), jnp.float32) * scale(obs_dim),
        "b1": jnp.zeros((1, feature_dim), jnp.float32),
        "ln_g": jnp.ones((1, feature_dim), jnp.float32),   # LayerNorm weight init = 1
        "ln_b": jnp.zeros((1, feature_dim), jnp.float32),  # LayerNorm bias init = 0
        "w2": jax.random.normal(k2, (feature_dim, hidden_dim), jnp.float32) * scale(feature_dim),
        "b2": jnp.zeros((1, hidden_dim), jnp.float32),
        "w3": jax.random.normal(k3, (hidden_dim, skill_dim), jnp.float32) * scale(hidden_dim),
        "b3": jnp.zeros((1, skill_dim), jnp.float32),
    }


def skill_actor_reference(obs, params):
    """Pure-JAX f32 reference for correctness checking."""
    h = obs @ params["w1"] + params["b1"]
    mean = jnp.mean(h, axis=-1, keepdims=True)
    var = jnp.mean((h - mean) ** 2, axis=-1, keepdims=True)
    h = (h - mean) / jnp.sqrt(var + LN_EPS) * params["ln_g"] + params["ln_b"]
    h = jnp.tanh(h)
    h = jnp.maximum(h @ params["w2"] + params["b2"], 0.0)
    return h @ params["w3"] + params["b3"]


if __name__ == "__main__":
    # Small shapes consistent with the module's MLP structure.
    batch, obs_dim, skill_dim, feature_dim, hidden_dim = 16, 24, 16, 32, 32

    key = jax.random.PRNGKey(0)
    k_obs, k_params = jax.random.split(key)
    obs = jax.random.normal(k_obs, (batch, obs_dim), jnp.float32)
    params = init_params(k_params, obs_dim, skill_dim, feature_dim, hidden_dim)

    ref = skill_actor_reference(obs, params)

    # Exact-path check (f32 MXU operands) against the f32 reference.
    logits_f32 = skill_actor_forward(obs, params, matmul_dtype=jnp.float32)
    logits_f32 = jax.block_until_ready(logits_f32)
    assert logits_f32.shape == (batch, skill_dim)
    assert jnp.allclose(logits_f32, ref, atol=1e-5, rtol=1e-5), "f32 path mismatch"

    # Fast path (default: bf16 MXU operands, f32 LayerNorm/tanh/ReLU epilogue).
    logits = skill_actor_forward(obs, params)
    logits = jax.block_until_ready(logits)
    assert logits.shape == (batch, skill_dim)
    assert jnp.allclose(logits, ref, atol=5e-2, rtol=5e-2), "bf16 path mismatch"

    print("KERNEL_OK")
</pallas_src>

<mosaic_0001>
module attributes {stable_mosaic.version = 11 : i64} {
  func.func @skill_actor_kernel(%arg0: i32, %arg1: memref<16x24xf32, #tpu.memory_space<vmem>>, %arg2: memref<24x32xf32, #tpu.memory_space<vmem>>, %arg3: memref<1x32xf32, #tpu.memory_space<vmem>>, %arg4: memref<1x32xf32, #tpu.memory_space<vmem>>, %arg5: memref<1x32xf32, #tpu.memory_space<vmem>>, %arg6: memref<32x32xf32, #tpu.memory_space<vmem>>, %arg7: memref<1x32xf32, #tpu.memory_space<vmem>>, %arg8: memref<32x128xf32, #tpu.memory_space<vmem>>, %arg9: memref<1x128xf32, #tpu.memory_space<vmem>>, %arg10: memref<16x128xf32, #tpu.memory_space<vmem>>) attributes {dimension_semantics = [#tpu.dimension_semantics<parallel>], iteration_bounds = array<i64: 1>, scalar_prefetch = 0 : i64, scratch_operands = 0 : i64, tpu.core_type = #tpu.core_type<tc>, window_params = [{transform_indices = @transform_0, window_bounds = array<i64: 16, 24>}, {pipeline_mode = #tpu.pipeline_mode<synchronous>, transform_indices = @transform_1, window_bounds = array<i64: 24, 32>}, {pipeline_mode = #tpu.pipeline_mode<synchronous>, transform_indices = @transform_2, window_bounds = array<i64: 1, 32>}, {pipeline_mode = #tpu.pipeline_mode<synchronous>, transform_indices = @transform_3, window_bounds = array<i64: 1, 32>}, {pipeline_mode = #tpu.pipeline_mode<synchronous>, transform_indices = @transform_4, window_bounds = array<i64: 1, 32>}, {pipeline_mode = #tpu.pipeline_mode<synchronous>, transform_indices = @transform_5, window_bounds = array<i64: 32, 32>}, {pipeline_mode = #tpu.pipeline_mode<synchronous>, transform_indices = @transform_6, window_bounds = array<i64: 1, 32>}, {pipeline_mode = #tpu.pipeline_mode<synchronous>, transform_indices = @transform_7, window_bounds = array<i64: 32, 128>}, {pipeline_mode = #tpu.pipeline_mode<synchronous>, transform_indices = @transform_8, window_bounds = array<i64: 1, 128>}, {transform_indices = @transform_9, window_bounds = array<i64: 16, 128>}]} {
    %c0 = arith.constant 0 : index
    %c0_0 = arith.constant 0 : index
    %0 = vector.load %arg1[%c0, %c0_0] : memref<16x24xf32, #tpu.memory_space<vmem>>, vector<16x24xf32>
    %c0_1 = arith.constant 0 : index
    %c0_2 = arith.constant 0 : index
    %1 = vector.load %arg2[%c0_1, %c0_2] : memref<24x32xf32, #tpu.memory_space<vmem>>, vector<24x32xf32>
    %cst = arith.constant dense<0.000000e+00> : vector<16x32xf32>
    %2 = tpu.matmul %0, %1, %cst {dimension_numbers = #tpu.dot_dimension_numbers<[1], [0], [0], [1], [0, 0, 1, 1], [], []>} : vector<16x24xf32>, vector<24x32xf32>, vector<16x32xf32> -> vector<16x32xf32>
    %c0_3 = arith.constant 0 : index
    %c0_4 = arith.constant 0 : index
    %3 = vector.load %arg3[%c0_3, %c0_4] : memref<1x32xf32, #tpu.memory_space<vmem>>, vector<1x32xf32>
    %4 = vector.broadcast %3 : vector<1x32xf32> to vector<16x32xf32>
    %5 = arith.addf %2, %4 : vector<16x32xf32>
    %cst_5 = arith.constant dense<0.000000e+00> : vector<16xf32>
    %6 = vector.multi_reduction <add>, %5, %cst_5 [1] : vector<16x32xf32> to vector<16xf32>
    %7 = vector.shape_cast %6 : vector<16xf32> to vector<16x1xf32>
    %cst_6 = arith.constant 3.200000e+01 : f32
    %8 = vector.broadcast %cst_6 : f32 to vector<16x1xf32>
    %9 = arith.divf %7, %8 : vector<16x1xf32>
    %10 = vector.broadcast %9 : vector<16x1xf32> to vector<16x32xf32>
    %11 = arith.subf %5, %10 : vector<16x32xf32>
    %12 = arith.mulf %11, %11 : vector<16x32xf32>
    %cst_7 = arith.constant dense<0.000000e+00> : vector<16xf32>
    %13 = vector.multi_reduction <add>, %12, %cst_7 [1] : vector<16x32xf32> to vector<16xf32>
    %14 = vector.shape_cast %13 : vector<16xf32> to vector<16x1xf32>
    %cst_8 = arith.constant 3.200000e+01 : f32
    %15 = vector.broadcast %cst_8 : f32 to vector<16x1xf32>
    %16 = arith.divf %14, %15 : vector<16x1xf32>
    %cst_9 = arith.constant 9.99999974E-6 : f32
    %17 = vector.broadcast %cst_9 : f32 to vector<16x1xf32>
    %18 = arith.addf %16, %17 : vector<16x1xf32>
    %19 = math.rsqrt %18 : vector<16x1xf32>
    %20 = vector.broadcast %19 : vector<16x1xf32> to vector<16x32xf32>
    %21 = arith.mulf %11, %20 : vector<16x32xf32>
    %c0_10 = arith.constant 0 : index
    %c0_11 = arith.constant 0 : index
    %22 = vector.load %arg4[%c0_10, %c0_11] : memref<1x32xf32, #tpu.memory_space<vmem>>, vector<1x32xf32>
    %23 = vector.broadcast %22 : vector<1x32xf32> to vector<16x32xf32>
    %24 = arith.mulf %21, %23 : vector<16x32xf32>
    %c0_12 = arith.constant 0 : index
    %c0_13 = arith.constant 0 : index
    %25 = vector.load %arg5[%c0_12, %c0_13] : memref<1x32xf32, #tpu.memory_space<vmem>>, vector<1x32xf32>
    %26 = vector.broadcast %25 : vector<1x32xf32> to vector<16x32xf32>
    %27 = arith.addf %24, %26 : vector<16x32xf32>
    %28 = math.tanh %27 : vector<16x32xf32>
    %c0_14 = arith.constant 0 : index
    %c0_15 = arith.constant 0 : index
    %29 = vector.load %arg6[%c0_14, %c0_15] : memref<32x32xf32, #tpu.memory_space<vmem>>, vector<32x32xf32>
    %cst_16 = arith.constant dense<0.000000e+00> : vector<16x32xf32>
    %30 = tpu.matmul %28, %29, %cst_16 {dimension_numbers = #tpu.dot_dimension_numbers<[1], [0], [0], [1], [0, 0, 1, 1], [], []>} : vector<16x32xf32>, vector<32x32xf32>, vector<16x32xf32> -> vector<16x32xf32>
    %c0_17 = arith.constant 0 : index
    %c0_18 = arith.constant 0 : index
    %31 = vector.load %arg7[%c0_17, %c0_18] : memref<1x32xf32, #tpu.memory_space<vmem>>, vector<1x32xf32>
    %32 = vector.broadcast %31 : vector<1x32xf32> to vector<16x32xf32>
    %33 = arith.addf %30, %32 : vector<16x32xf32>
    %cst_19 = arith.constant 0.000000e+00 : f32
    %34 = vector.broadcast %cst_19 : f32 to vector<16x32xf32>
    %35 = arith.maximumf %33, %34 : vector<16x32xf32>
    %c0_20 = arith.constant 0 : index
    %c0_21 = arith.constant 0 : index
    %36 = vector.load %arg8[%c0_20, %c0_21] : memref<32x128xf32, #tpu.memory_space<vmem>>, vector<32x128xf32>
    %cst_22 = arith.constant dense<0.000000e+00> : vector<16x128xf32>
    %37 = tpu.matmul %35, %36, %cst_22 {dimension_numbers = #tpu.dot_dimension_numbers<[1], [0], [0], [1], [0, 0, 1, 1], [], []>} : vector<16x32xf32>, vector<32x128xf32>, vector<16x128xf32> -> vector<16x128xf32>
    %c0_23 = arith.constant 0 : index
    %c0_24 = arith.constant 0 : index
    %38 = vector.load %arg9[%c0_23, %c0_24] : memref<1x128xf32, #tpu.memory_space<vmem>>, vector<1x128xf32>
    %39 = vector.broadcast %38 : vector<1x128xf32> to vector<16x128xf32>
    %40 = arith.addf %37, %39 : vector<16x128xf32>
    %c0_25 = arith.constant 0 : index
    %c0_26 = arith.constant 0 : index
    %41 = vector.load %arg10[%c0_25, %c0_26] : memref<16x128xf32, #tpu.memory_space<vmem>>, vector<16x128xf32>
    tpu.vector_store %arg10[%c0_25, %c0_26], %40 {strides = array<i32>} : memref<16x128xf32, #tpu.memory_space<vmem>>, vector<16x128xf32>,
    return
  }
  func.func @transform_0(%arg0: i32) -> (i32, i32) {
    %c0_i32 = arith.constant 0 : i32
    %c0_i32_0 = arith.constant 0 : i32
    return %arg0, %c0_i32 : i32, i32
  }
  func.func @transform_1(%arg0: i32) -> (i32, i32) {
    %c0_i32 = arith.constant 0 : i32
    %c0_i32_0 = arith.constant 0 : i32
    %c0_i32_1 = arith.constant 0 : i32
    return %c0_i32, %c0_i32_0 : i32, i32
  }
  func.func @transform_2(%arg0: i32) -> (i32, i32) {
    %c0_i32 = arith.constant 0 : i32
    %c0_i32_0 = arith.constant 0 : i32
    %c0_i32_1 = arith.constant 0 : i32
    return %c0_i32, %c0_i32_0 : i32, i32
  }
  func.func @transform_3(%arg0: i32) -> (i32, i32) {
    %c0_i32 = arith.constant 0 : i32
    %c0_i32_0 = arith.constant 0 : i32
    %c0_i32_1 = arith.constant 0 : i32
    return %c0_i32, %c0_i32_0 : i32, i32
  }
  func.func @transform_4(%arg0: i32) -> (i32, i32) {
    %c0_i32 = arith.constant 0 : i32
    %c0_i32_0 = arith.constant 0 : i32
    %c0_i32_1 = arith.constant 0 : i32
    return %c0_i32, %c0_i32_0 : i32, i32
  }
  func.func @transform_5(%arg0: i32) -> (i32, i32) {
    %c0_i32 = arith.constant 0 : i32
    %c0_i32_0 = arith.constant 0 : i32
    %c0_i32_1 = arith.constant 0 : i32
    return %c0_i32, %c0_i32_0 : i32, i32
  }
  func.func @transform_6(%arg0: i32) -> (i32, i32) {
    %c0_i32 = arith.constant 0 : i32
    %c0_i32_0 = arith.constant 0 : i32
    %c0_i32_1 = arith.constant 0 : i32
    return %c0_i32, %c0_i32_0 : i32, i32
  }
  func.func @transform_7(%arg0: i32) -> (i32, i32) {
    %c0_i32 = arith.constant 0 : i32
    %c0_i32_0 = arith.constant 0 : i32
    %c0_i32_1 = arith.constant 0 : i32
    return %c0_i32, %c0_i32_0 : i32, i32
  }
  func.func @transform_8(%arg0: i32) -> (i32, i32) {
    %c0_i32 = arith.constant 0 : i32
    %c0_i32_0 = arith.constant 0 : i32
    %c0_i32_1 = arith.constant 0 : i32
    return %c0_i32, %c0_i32_0 : i32, i32
  }
  func.func @transform_9(%arg0: i32) -> (i32, i32) {
    %c0_i32 = arith.constant 0 : i32
    %c0_i32_0 = arith.constant 0 : i32
    return %arg0, %c0_i32 : i32, i32
  }
}

</mosaic_0001>

<bundles_post_ra>
// kernel: tpu_custom_call.1
= control target key start
LH: loop header
LB: loop body
LE: loop exit
PB: predicated region body
PF: predicated region fallthrough
CT: control target
= control target key end

     0   :  { %14 = vsyncpa [#allocation3], 0  ;;  %s729_s0 = inlined_call_operand.hbm [shape: f32[16,24], index: 0, kind: input, shape index: {}]   ;;  %s730_s1 = inlined_call_operand.hbm [shape: f32[24,32], index: 1, kind: input, shape index: {}]   ;;  %s731_s2 = inlined_call_operand.vmem [shape: f32[1,32], index: 2, kind: input, shape index: {}]   ;;  %s732_s3 = inlined_call_operand.vmem [shape: f32[1,32], index: 3, kind: input, shape index: {}]   ;;  %s733_s4 = inlined_call_operand.vmem [shape: f32[1,32], index: 4, kind: input, shape index: {}]   ;;  %s734_s5 = inlined_call_operand.hbm [shape: f32[32,32], index: 5, kind: input, shape index: {}]   ;;  %s735_s6 = inlined_call_operand.vmem [shape: f32[1,32], index: 6, kind: input, shape index: {}]   ;;  %s736_s7 = inlined_call_operand.hbm [shape: f32[32,128], index: 7, kind: input, shape index: {}]   ;;  %s737_s8 = inlined_call_operand.vmem [shape: f32[1,128], index: 8, kind: input, shape index: {}]   ;;  %s738_s9 = inlined_call_operand.hbm [shape: f32[16,128], index: 9, kind: output, shape index: {}]  }
   0x1   :  { %15 = vsyncpa [#allocation6], 0 }
   0x2   :  { %16 = vsyncpa [#allocation9], 0 }
   0x3   :  { %17 = vsyncpa [#allocation4], 0  ;;  %s619_s30 = smov [#allocation5]   ;;  %s620_s11 = smov [#allocation2]  }
   0x4   :  { %s35_s10 = sshll.u32 %s619_s30, 4  ;;  %s23_s12 = sshll.u32 %s620_s11, 4  ;;  %s36_s10 = int_to_ptr.vmem [resolvable:$true] %s35_s10  ;;  %s24_s12 = int_to_ptr.vmem [resolvable:$true] %s23_s12 }
   0x5   :  { %s519_s13 = scalar_lea.vmem %s36_s10, 384  ;;  %p524_p1 = scmp.lt.s32.totalorder %s36_s10, %s36_s10 }
   0x6   :  { %p520_p0 = scmp.ne.s32.totalorder %s36_s10, %s519_s13  ;;  %p525_p2 = scmp.lt.s32.totalorder %s519_s13, %s519_s13 }
   0x8   :  { %p526_p3 = por %p525_p2, %p524_p1 }
   0xa   :  { %p527_p4 = pnand %p526_p3, %p520_p0 }
   0xc   :  { %530 = shalt.err (!%p527_p4)
}
   0xd   :  { %s621_s14 = smov 128   ;;  %s622_s15 = smov 8  }
   0xe   :  { %41 = dma.hbm_to_vmem [thread:$0]  %s730_s1, 384, %s36_s10, [#allocation6], %s621_s14, %s621_s14, %s622_s15  }
   0xf   :  { %s539_s18 = scalar_lea.vmem %s24_s12, 256  ;;  %p544_p6 = scmp.lt.s32.totalorder %s24_s12, %s24_s12 }
  0x10   :  { %p540_p5 = scmp.ne.s32.totalorder %s24_s12, %s539_s18  ;;  %p545_p7 = scmp.lt.s32.totalorder %s539_s18, %s539_s18 }
  0x12   :  { %p546_p8 = por %p545_p7, %p544_p6 }
  0x14   :  { %p547_p9 = pnand %p546_p8, %p540_p5 }
  0x16   :  { %550 = shalt.err (!%p547_p9)
}
  0x17   :  { %29 = dma.hbm_to_vmem [thread:$0]  %s729_s0, 256, %s24_s12, [#allocation3], %s621_s14, %s621_s14, %s622_s15  }
  0x18   :  { %s623_s21 = smov [#allocation7]   ;;  %s624_s23 = smov [#allocation8]  }
  0x19   :  { %s53_s22 = sshll.u32 %s623_s21, 4  ;;  %s67_s24 = sshll.u32 %s624_s23, 4  ;;  %s54_s22 = int_to_ptr.vmem [resolvable:$true] %s53_s22  ;;  %s68_s24 = int_to_ptr.vmem [resolvable:$true] %s67_s24 }
  0x1a   :  { %s559_s1 = scalar_lea.vmem %s54_s22, 512  ;;  %p564_p11 = scmp.lt.s32.totalorder %s54_s22, %s54_s22 }
  0x1b   :  { %p560_p10 = scmp.ne.s32.totalorder %s54_s22, %s559_s1  ;;  %p565_p12 = scmp.lt.s32.totalorder %s559_s1, %s559_s1 }
  0x1d   :  { %p566_p13 = por %p565_p12, %p564_p11 }
  0x1f   :  { %p567_p0 = pnand %p566_p13, %p560_p10 }
  0x21   :  { %570 = shalt.err (!%p567_p0)
}
  0x22   :  { %59 = dma.hbm_to_vmem [thread:$0]  %s734_s5, 512, %s54_s22, [#allocation6], %s621_s14, %s621_s14, %s622_s15  }
  0x23   :  { %s579_s0 = scalar_lea.vmem %s68_s24, 512  ;;  %p584_p2 = scmp.lt.s32.totalorder %s68_s24, %s68_s24 }
  0x24   :  { %p580_p1 = scmp.ne.s32.totalorder %s68_s24, %s579_s0  ;;  %p585_p3 = scmp.lt.s32.totalorder %s579_s0, %s579_s0 }
  0x26   :  { %p586_p4 = por %p585_p3, %p584_p2 }
  0x28   :  { %p587_p5 = pnand %p586_p4, %p580_p1 }
  0x2a   :  { %590 = shalt.err (!%p587_p5)
}
  0x2b   :  { %73 = dma.hbm_to_vmem [thread:$0]  %s736_s7, 512, %s68_s24, [#allocation9], %s621_s14, %s621_s14, %s622_s15  }
  0x2c   :  { %611 = dma.done.wait [#allocation3], 256  }
  0x2d   :  { %612 = vsyncadd [#allocation3], 4294967040 }
  0x2e   :  { %613 = dma.done.wait [#allocation6], 896  }
  0x2f   :  { %614 = vsyncadd [#allocation6], 4294966400 }
  0x30   :  { %615 = dma.done.wait [#allocation9], 512  }
  0x31   :  { %616 = vsyncadd [#allocation9], 4294966784  ;;  %vm100_vm0 = vcmask 195584   ;;  %v92_v0 = vld [vmem:[#allocation5 + $0x10] sm:$0xff]  ;;  %v91_v1 = vld [vmem:[#allocation5 + $0x8] sm:$0xff]  ;;  %vm182_vm1 = vcmask 261120  }
  0x32   :  { %465 = vmatprep.subr.mxu0 %v92_v0  ;;  %v88_v2 = vld [vmem:[#allocation2] sm:$0xff]  ;;  %v90_v3 = vld [vmem:[#allocation5] sm:$0xff]  ;;  %v89_v4 = vld [vmem:[#allocation2 + $0x8] sm:$0xff]  ;;  %s625_s13 = smov [#allocation10]  }
  0x33   :  { %466 = vmatpush3.msra.mxu0 %v92_v0  ;;  %471 = vmatprep.mubr.msk.f32.mxu0 %vm100_vm0, %v88_v2  ;;  %v437_v6 = vld [vmem:[%s731_s2] ss:$0 sm:$0xff]  ;;  %v232_v23 = vld [vmem:[#allocation7 + $0x10] sm:$0xff]  ;;  %v231_v24 = vld [vmem:[#allocation7 + $0x8] sm:$0xff]  ;;  %s423_s16 = sshll.u32 %s625_s13, 4  ;;  %s424_s16 = int_to_ptr.vmem [resolvable:$true] %s423_s16 }
  0x34   :  { %467 = vmatprep.subr.mxu0 %v91_v1  ;;  %v233_v22 = vld [vmem:[#allocation7 + $0x18] sm:$0xff]  ;;  %v230_v25 = vld [vmem:[#allocation7] sm:$0xff]  ;;  %v326_v45 = vld [vmem:[#allocation8 + $0x10] sm:$0xff]  ;;  %p596_p7 = scmp.lt.s32.totalorder %s424_s16, %s424_s16 }
  0x35   :  { %468 = vmatpush3.msra.mxu0 %v91_v1  ;;  %474 = vmatprep.subr.mxu1 %v233_v22  ;;  %v440_v33 = vld [vmem:[%s732_s3] ss:$0 sm:$0xff]  ;;  %v325_v46 = vld [vmem:[#allocation8 + $0x8] sm:$0xff]  ;;  %v324_v47 = vld [vmem:[#allocation8] sm:$0xff] }
  0x36   :  { %469 = vmatprep.subr.mxu0 %v90_v3  ;;  %475 = vmatpush3.msra.mxu1 %v233_v22  ;;  %v441_v35 = vld [vmem:[%s733_s4] ss:$0 sm:$0xff] }
  0x37   :  { %470 = vmatpush3.msra.mxu0 %v90_v3  ;;  %476 = vmatprep.subr.mxu1 %v232_v23  ;;  %v327_v44 = vld [vmem:[#allocation8 + $0x18] sm:$0xff] }
  0x38   :  { %472 = vmatmul.mubr.msk.f32.vlgmr.msra.gmra.mxu0 %vm100_vm0, %v89_v4  ;;  %477 = vmatpush3.msra.mxu1 %v232_v23  ;;  %v442_v48 = vld [vmem:[%s735_s6] ss:$0 sm:$0xff]  ;;  %s591_s6 = scalar_lea.vmem %s424_s16, 256 }
  0x39   :  { %478 = vmatprep.subr.mxu1 %v231_v24  ;;  %485 = vmatprep.subr.mxu0 %v327_v44  ;;  %v445_v55 = vld [vmem:[%s737_s8] ss:$0 sm:$0xff]  ;;  %p592_p6 = scmp.ne.s32.totalorder %s424_s16, %s591_s6  ;;  %p597_p8 = scmp.lt.s32.totalorder %s591_s6, %s591_s6 }
  0x3a   :  { %479 = vmatpush3.msra.mxu1 %v231_v24  ;;  %486 = vmatpush3.msra.mxu0 %v327_v44 }
  0x3b   :  { %480 = vmatprep.subr.mxu1 %v230_v25  ;;  %487 = vmatprep.subr.mxu0 %v326_v45  ;;  %p598_p9 = por %p597_p8, %p596_p7 }
  0x3c   :  { %481 = vmatpush3.msra.mxu1 %v230_v25  ;;  %488 = vmatpush3.msra.mxu0 %v326_v45 }
  0x3d   :  { %489 = vmatprep.subr.mxu0 %v325_v46  ;;  %p599_p10 = pnand %p598_p9, %p592_p6 }
  0x3e   :  { %490 = vmatpush3.msra.mxu0 %v325_v46 }
  0x3f   :  { %491 = vmatprep.subr.mxu0 %v324_v47 }
  0x40   :  { %492 = vmatpush3.msra.mxu0 %v324_v47 }
  0xf8   :  { %v473_v5 = vpop.f32.mrf.mxu0 }
  0xf9   :  { %v179_v9 = vadd.f32 %v473_v5, %v437_v6 }
  0xfa   :  { %v173_v7 = vpop.f32.mrf.mxu0 }
  0xfb   :  { %v174_v8 = vadd.f32 %v437_v6, %v173_v7  ;;  %v186_v11 = vsel %vm182_vm1, %v179_v9, 0.0 }
  0xfd   :  { %v183_v10 = vsel %vm182_vm1, %v174_v8, 0.0 }
  0xfe   :  { %184 = vadd.xlane.f32.xlu0 %v183_v10 }
 0x102   :  { %187 = vadd.xlane.f32.xlu0 %v186_v11 }
 0x187   :  { %v185_v12 = vpop.xlane.xlu0 %184 }
 0x188   :  { %v190_v13 = vmul.f32 0.03125, %v185_v12 }
 0x18a   :  { %v192_v14 = vsub.f32 %v174_v8, %v190_v13 }
 0x18b   :  { %v188_v15 = vpop.xlane.xlu0 %187 }
 0x18c   :  { %v191_v16 = vmul.f32 0.03125, %v188_v15  ;;  %v194_v17 = vmul.f32 %v192_v14, %v192_v14 }
 0x18e   :  { %v193_v18 = vsub.f32 %v179_v9, %v191_v16  ;;  %v196_v19 = vsel %vm182_vm1, %v194_v17, 0.0 }
 0x18f   :  { %197 = vadd.xlane.f32.xlu1 %v196_v19 }
 0x190   :  { %v195_v20 = vmul.f32 %v193_v18, %v193_v18 }
 0x192   :  { %v199_v21 = vsel %vm182_vm1, %v195_v20, 0.0 }
 0x193   :  { %200 = vadd.xlane.f32.xlu1 %v199_v21 }
 0x218   :  { %v198_v26 = vpop.xlane.xlu1 %197 }
 0x219   :  { %v202_v27 = vmul.f32 0.03125, %v198_v26 }
 0x21b   :  { %v204_v28 = vadd.f32 1e-05, %v202_v27 }
 0x21c   :  { %v201_v29 = vpop.xlane.xlu1 %200 }
 0x21d   :  { %503 = vrsqrt.f32 %v204_v28  ;;  %v203_v30 = vmul.f32 0.03125, %v201_v29 }
 0x21f   :  { %v205_v31 = vadd.f32 1e-05, %v203_v30 }
 0x221   :  { %505 = vrsqrt.f32 %v205_v31 }
 0x22a   :  { %v504_v32 = vpop.eup %503 }
 0x22b   :  { %v208_v34 = vmul.f32 %v504_v32, %v192_v14 }
 0x22d   :  { %v217_v36 = vmul.f32 %v440_v33, %v208_v34 }
 0x22e   :  { %v506_v37 = vpop.eup %505 }
 0x22f   :  { %v209_v38 = vmul.f32 %v506_v37, %v193_v18  ;;  %v226_v39 = vadd.f32 %v441_v35, %v217_v36 }
 0x231   :  { %v218_v40 = vmul.f32 %v440_v33, %v209_v38  ;;  %507 = vtanh.f32 %v226_v39 }
 0x233   :  { %v227_v41 = vadd.f32 %v441_v35, %v218_v40 }
 0x235   :  { %509 = vtanh.f32 %v227_v41 }
 0x23e   :  { %v508_v42 = vpop.eup %507 }
 0x23f   :  { %482 = vmatprep.mubr.msk.f32.mxu1 %vm182_vm1, %v508_v42 }
 0x242   :  { %v510_v43 = vpop.eup %509 }
 0x243   :  { %483 = vmatmul.mubr.msk.f32.vlgmr.msra.gmra.mxu1 %vm182_vm1, %v510_v43 }
 0x303   :  { %v484_v49 = vpop.f32.mrf.mxu1 }
 0x304   :  { %v319_v50 = vadd.f32 %v484_v49, %v442_v48 }
 0x305   :  { %v313_v51 = vpop.f32.mrf.mxu1 }
 0x306   :  { %v314_v52 = vadd.f32 %v442_v48, %v313_v51  ;;  %v323_v54 = vmax.f32 %v319_v50, 0.0 }
 0x308   :  { %v322_v53 = vmax.f32 %v314_v52, 0.0 }
 0x30a   :  { %493 = vmatprep.mubr.msk.f32.mxu0 %vm182_vm1, %v322_v53 }
 0x30b   :  { %494 = vmatmul.mubr.msk.f32.vlgmr.msra.gmra.mxu0 %vm182_vm1, %v323_v54 }
 0x3cb   :  { %v495_v56 = vpop.f32.mrf.mxu0 }
 0x3cc   :  { %v413_v57 = vadd.f32 %v495_v56, %v445_v55 }
 0x3cd   :  { %v407_v58 = vpop.f32.mrf.mxu0 }
 0x3ce   :  { %417 = vst [vmem:[#allocation10 + $0x8] sm:$0xff] %v413_v57  ;;  %v408_v59 = vadd.f32 %v445_v55, %v407_v58 }
 0x3d0   :  { %416 = vst [vmem:[#allocation10] sm:$0xff] %v408_v59 }
 0x3d1   :  { %602 = shalt.err (!%p599_p10)
}
 0x3d2   :  { %429 = dma.vmem_to_hbm [thread:$0]  %s424_s16, 256, %s738_s9, [#allocation4], %s621_s14, %s621_s14, %s622_s15  }
 0x3d3   :  { %617 = dma.done.wait [#allocation4], 256  }
 0x3d4   :  { %618 = vsyncadd [#allocation4], 4294967040 }
 0x3d5   :  { %433 = vsyncpa [#allocation3], 1 }
 0x3d6   :  { %434 = vsyncpa [#allocation6], 1 }
 0x3d7   :  { %435 = vsyncpa [#allocation9], 1 }
 0x3d8   :  { %436 = vsyncpa [#allocation4], 1 }

</bundles_post_ra>
